<compile_context>
chip_gen: v5e
topology: v5e:2x2
jax: 0.10.0
libtpu: 0.0.40
codegen_flags: <defaults>
</compile_context>

<pallas_src>
import functools

import jax
import jax.numpy as jnp
from jax import lax
from jax.experimental import pallas as pl
from jax.experimental.pallas import tpu as pltpu


def _multi_accuracy_kernel(logits_ref, labels_ref, count_ref, *, n_valid, bpp):
    p = pl.program_id(0)          # parallel partial-sum axis (megacore split on v7x)
    i = pl.program_id(1)          # reduction over the batch tiles owned by part p

    @pl.when(i == 0)
    def _():
        count_ref[...] = jnp.zeros_like(count_ref)

    x = logits_ref[...]                                            # (tb, C) f32
    y = labels_ref[...]                                            # (tb, 1) i32
    tb, num_classes = x.shape

    # argmax over classes with first-occurrence tie-break (matches torch.argmax).
    maxv = jnp.max(x, axis=1, keepdims=True)                       # (tb, 1)
    col = lax.broadcasted_iota(jnp.int32, x.shape, 1)              # (tb, C)
    pred = jnp.min(jnp.where(x == maxv, col, num_classes),
                   axis=1, keepdims=True)                          # (tb, 1)

    # Mask rows past the end of the batch: covers the ragged last tile and any
    # clamped overshoot blocks of the parallel split.
    blk = p * bpp + i
    row = lax.broadcasted_iota(jnp.int32, (tb, 1), 0) + blk * tb
    valid = row < n_valid
    correct = jnp.where(valid & (pred == y), 1.0, 0.0).astype(jnp.float32)

    # Per-tile sum is exact in f32 (<= tb <= 1024); accumulate across tiles in i32.
    s = jnp.sum(correct).astype(jnp.int32)
    lane = lax.broadcasted_iota(jnp.int32, count_ref.shape, 1)     # (1, 128)
    count_ref[...] += jnp.where(lane == 0, s, 0)


def _choose_tb(n, c, *, max_tb, vmem_budget_bytes=24 << 20):
    """Largest row tile whose double-buffered inputs fit the VMEM budget."""
    bytes_per_row = (c + 1) * 4                      # f32 logits row + i32 label
    tb = vmem_budget_bytes // (2 * bytes_per_row)    # 2x for double buffering
    tb = max(8, min(max_tb, tb))
    # TODO(synk): for vocab-scale C where even 8 rows overflow VMEM, add a class
    # (reduction) grid axis with running-max / running-argmin scratch instead.
    tb = min(tb, n)
    if n >= 8:
        tb = max(8, (tb // 8) * 8)                   # sublane-aligned tile
    return tb


def multi_accuracy(logits, labels, *, max_tb=1024, num_parts=2):
    """Pallas equivalent of MultiAccuracy.forward: mean(argmax(logits, 1) == labels)."""
    n, c = logits.shape
    logits = logits.astype(jnp.float32)
    labels = labels.astype(jnp.int32).reshape(n, 1)

    tb = _choose_tb(n, c, max_tb=max_tb)
    nblocks = pl.cdiv(n, tb)
    num_parts = max(1, min(num_parts, nblocks))
    bpp = pl.cdiv(nblocks, num_parts)                # batch blocks per parallel part

    def in_map(p, i):
        # Clamp overshoot blocks of the parallel split; the kernel masks them out.
        return (jnp.minimum(p * bpp + i, nblocks - 1), 0)

    counts = pl.pallas_call(
        functools.partial(_multi_accuracy_kernel, n_valid=n, bpp=bpp),
        out_shape=jax.ShapeDtypeStruct((1, num_parts * 128), jnp.int32),
        grid=(num_parts, bpp),
        in_specs=[
            pl.BlockSpec((tb, c), in_map),
            pl.BlockSpec((tb, 1), in_map),
        ],
        out_specs=pl.BlockSpec((1, 128), lambda p, i: (0, p)),
        compiler_params=pltpu.CompilerParams(
            dimension_semantics=("parallel", "arbitrary"),
            vmem_limit_bytes=48 << 20),
    )(logits, labels)

    return jnp.sum(counts).astype(jnp.float32) / jnp.float32(n)


if __name__ == "__main__":
    key = jax.random.PRNGKey(0)
    k1, k2, k3, k4 = jax.random.split(key, 4)

    # Spec-consistent small case: batch=8, num_classes=16.
    logits = jax.random.normal(k1, (8, 16), dtype=jnp.float32)
    labels = jax.random.randint(k2, (8,), 0, 16, dtype=jnp.int32)
    acc = jax.block_until_ready(multi_accuracy(logits, labels))
    ref = jnp.mean((jnp.argmax(logits, axis=1) == labels).astype(jnp.float32))
    assert jnp.allclose(acc, ref, atol=1e-6), (acc, ref)

    # Ragged batch exercising both parallel partials, the clamped overshoot block,
    # and a partial last tile (n=70, tb=16 -> 5 blocks across 2 parts).
    logits2 = jax.random.normal(k3, (70, 7), dtype=jnp.float32)
    labels2 = jax.random.randint(k4, (70,), 0, 7, dtype=jnp.int32)
    acc2 = jax.block_until_ready(multi_accuracy(logits2, labels2, max_tb=16))
    ref2 = jnp.mean((jnp.argmax(logits2, axis=1) == labels2).astype(jnp.float32))
    assert jnp.allclose(acc2, ref2, atol=1e-6), (acc2, ref2)

    print("KERNEL_OK")
</pallas_src>

<mosaic_0001>
module attributes {stable_mosaic.version = 11 : i64} {
  func.func @_multi_accuracy_kernel(%arg0: i32, %arg1: i32, %arg2: memref<8x16xf32, #tpu.memory_space<vmem>>, %arg3: memref<8x1xi32, #tpu.memory_space<vmem>>, %arg4: memref<1x128xi32, #tpu.memory_space<vmem>>) attributes {dimension_semantics = [#tpu.dimension_semantics<parallel>, #tpu.dimension_semantics<arbitrary>], iteration_bounds = array<i64: 1, 1>, scalar_prefetch = 0 : i64, scratch_operands = 0 : i64, tpu.core_type = #tpu.core_type<tc>, window_params = [{transform_indices = @transform_0, window_bounds = array<i64: 8, 16>}, {transform_indices = @transform_1, window_bounds = array<i64: 8, 1>}, {transform_indices = @transform_2, window_bounds = array<i64: 1, 128>}]} {
    %c0_i32 = arith.constant 0 : i32
    %0 = arith.cmpi eq, %arg1, %c0_i32 : i32
    %1 = arith.extui %0 : i1 to i32
    %c0_i32_0 = arith.constant 0 : i32
    %2 = arith.cmpi ne, %1, %c0_i32_0 : i32
    scf.if %2 {
      %c0_i32_15 = arith.constant 0 : i32
      %41 = vector.broadcast %c0_i32_15 : i32 to vector<1x128xi32>
      %c0_16 = arith.constant 0 : index
      %c0_17 = arith.constant 0 : index
      %42 = vector.load %arg4[%c0_16, %c0_17] : memref<1x128xi32, #tpu.memory_space<vmem>>, vector<1x128xi32>
      tpu.vector_store %arg4[%c0_16, %c0_17], %41 {strides = array<i32>} : memref<1x128xi32, #tpu.memory_space<vmem>>, vector<1x128xi32>,
    } else {
    }
    %c0 = arith.constant 0 : index
    %c0_1 = arith.constant 0 : index
    %3 = vector.load %arg2[%c0, %c0_1] : memref<8x16xf32, #tpu.memory_space<vmem>>, vector<8x16xf32>
    %c0_2 = arith.constant 0 : index
    %c0_3 = arith.constant 0 : index
    %4 = vector.load %arg3[%c0_2, %c0_3] : memref<8x1xi32, #tpu.memory_space<vmem>>, vector<8x1xi32>
    %cst = arith.constant dense<0xFF800000> : vector<8xf32>
    %5 = vector.multi_reduction <maximumf>, %3, %cst [1] : vector<8x16xf32> to vector<8xf32>
    %6 = vector.shape_cast %5 : vector<8xf32> to vector<8x1xf32>
    %7 = tpu.iota {dimensions = array<i32: 1>} : vector<8x16xi32>
    %8 = vector.broadcast %6 : vector<8x1xf32> to vector<8x16xf32>
    %9 = arith.cmpf oeq, %3, %8 : vector<8x16xf32>
    %c16_i32 = arith.constant 16 : i32
    %10 = vector.broadcast %c16_i32 : i32 to vector<8x16xi32>
    %11 = arith.select %9, %7, %10 : vector<8x16xi1>, vector<8x16xi32>
    %cst_4 = arith.constant dense<2147483647> : vector<8xi32>
    %12 = vector.multi_reduction <minsi>, %11, %cst_4 [1] : vector<8x16xi32> to vector<8xi32>
    %13 = vector.shape_cast %12 : vector<8xi32> to vector<8x1xi32>
    %c1_i32 = arith.constant 1 : i32
    %14 = arith.muli %arg0, %c1_i32 : i32
    %15 = arith.addi %14, %arg1 : i32
    %16 = tpu.iota {dimensions = array<i32: 0>} : vector<8x1xi32>
    %c8_i32 = arith.constant 8 : i32
    %17 = arith.muli %15, %c8_i32 : i32
    %18 = vector.broadcast %17 : i32 to vector<8x1xi32>
    %19 = arith.addi %16, %18 : vector<8x1xi32>
    %c8_i32_5 = arith.constant 8 : i32
    %20 = vector.broadcast %c8_i32_5 : i32 to vector<8x1xi32>
    %21 = arith.cmpi slt, %19, %20 : vector<8x1xi32>
    %22 = arith.cmpi eq, %13, %4 : vector<8x1xi32>
    %23 = arith.andi %21, %22 : vector<8x1xi1>
    %cst_6 = arith.constant 1.000000e+00 : f32
    %cst_7 = arith.constant 0.000000e+00 : f32
    %24 = vector.broadcast %cst_6 : f32 to vector<8x1xf32>
    %25 = vector.broadcast %cst_7 : f32 to vector<8x1xf32>
    %26 = arith.select %23, %24, %25 : vector<8x1xi1>, vector<8x1xf32>
    %27 = vector.shape_cast %26 : vector<8x1xf32> to vector<1x8x1xf32>
    %cst_8 = arith.constant dense<0.000000e+00> : vector<1xf32>
    %28 = vector.multi_reduction <add>, %27, %cst_8 [1, 2] : vector<1x8x1xf32> to vector<1xf32>
    %29 = vector.shape_cast %28 : vector<1xf32> to vector<1x1x1xf32>
    %30 = vector.extract %29[0, 0, 0] : f32 from vector<1x1x1xf32>
    %31 = arith.fptosi %30 : f32 to i32
    %32 = tpu.iota {dimensions = array<i32: 1>} : vector<1x128xi32>
    %c0_9 = arith.constant 0 : index
    %c0_10 = arith.constant 0 : index
    %33 = vector.load %arg4[%c0_9, %c0_10] : memref<1x128xi32, #tpu.memory_space<vmem>>, vector<1x128xi32>
    %c0_i32_11 = arith.constant 0 : i32
    %34 = vector.broadcast %c0_i32_11 : i32 to vector<1x128xi32>
    %35 = arith.cmpi eq, %32, %34 : vector<1x128xi32>
    %c0_i32_12 = arith.constant 0 : i32
    %36 = vector.broadcast %31 : i32 to vector<1x128xi32>
    %37 = vector.broadcast %c0_i32_12 : i32 to vector<1x128xi32>
    %38 = arith.select %35, %36, %37 : vector<1x128xi1>, vector<1x128xi32>
    %39 = arith.addi %33, %38 : vector<1x128xi32>
    %c0_13 = arith.constant 0 : index
    %c0_14 = arith.constant 0 : index
    %40 = vector.load %arg4[%c0_13, %c0_14] : memref<1x128xi32, #tpu.memory_space<vmem>>, vector<1x128xi32>
    tpu.vector_store %arg4[%c0_13, %c0_14], %39 {strides = array<i32>} : memref<1x128xi32, #tpu.memory_space<vmem>>, vector<1x128xi32>,
    return
  }
  func.func @transform_0(%arg0: i32, %arg1: i32) -> (i32, i32) {
    %c1_i32 = arith.constant 1 : i32
    %0 = arith.muli %arg0, %c1_i32 : i32
    %1 = arith.addi %0, %arg1 : i32
    %c0_i32 = arith.constant 0 : i32
    %2 = arith.minsi %1, %c0_i32 : i32
    %c0_i32_0 = arith.constant 0 : i32
    %c0_i32_1 = arith.constant 0 : i32
    return %2, %c0_i32_0 : i32, i32
  }
  func.func @transform_1(%arg0: i32, %arg1: i32) -> (i32, i32) {
    %c1_i32 = arith.constant 1 : i32
    %0 = arith.muli %arg0, %c1_i32 : i32
    %1 = arith.addi %0, %arg1 : i32
    %c0_i32 = arith.constant 0 : i32
    %2 = arith.minsi %1, %c0_i32 : i32
    %c0_i32_0 = arith.constant 0 : i32
    %c0_i32_1 = arith.constant 0 : i32
    return %2, %c0_i32_0 : i32, i32
  }
  func.func @transform_2(%arg0: i32, %arg1: i32) -> (i32, i32) {
    %c0_i32 = arith.constant 0 : i32
    %c0_i32_0 = arith.constant 0 : i32
    return %c0_i32, %arg0 : i32, i32
  }
}

</mosaic_0001>

<bundles_post_ra>
// kernel: tpu_custom_call.1
= control target key start
LH: loop header
LB: loop body
LE: loop exit
PB: predicated region body
PF: predicated region fallthrough
CT: control target
= control target key end

     0   :  { %vm73_vm0 = vcmask 130048   ;;  %s215_s0 = inlined_call_operand.vmem [shape: f32[8,16], index: 0, kind: input, shape index: {}]   ;;  %s216_s1 = inlined_call_operand.vmem [shape: s32[8,1], index: 1, kind: input, shape index: {}]   ;;  %s217_s2 = inlined_call_operand.hbm [shape: s32[1,128], index: 2, kind: output, shape index: {}]  }
   0x1   :  { %v71_v0 = vld [vmem:[%s215_s0] sm:$0xff] }
   0x2   :  { %7 = vsyncpa [#allocation3], 0  ;;  %v74_v1 = vsel %vm73_vm0, %v71_v0, -inf  ;;  %v77_v2 = vlaneseq  ;;  %v72_v17 = vld [vmem:[%s216_s1] sm:$0xff]  ;;  %vm106_vm3 = vcmask 7168   ;;  %v188_v19 = vmov 0.0  }
   0x3   :  { %75 = vmax.xlane.f32.xlu0 %v74_v1  ;;  %v189_v29 = vmov 0   ;;  %s190_s15 = smov [#allocation2]   ;;  %s131_s19 = sshll.u32 %s217_s2, 4  ;;  %s132_s19 = int_to_ptr.hbm [resolvable:$true] %s131_s19 }
   0x4   :  { %v78_v3 = vand.u32 127, %v77_v2  ;;  %70 = vst [vmem:[#allocation2] sm:$0x1] %v189_v29  ;;  %s129_s16 = sshll.u32 %s190_s15, 4  ;;  %s130_s16 = int_to_ptr.vmem [resolvable:$true] %s129_s16 }
   0x6   :  { %vm119_vm5 = vcmp.eq.s32.totalorder %v78_v3, 0 }
   0xb   :  { %v118_v30 = vld [vmem:[#allocation2] sm:$0x1] }
  0x76   :  { %v76_v4 = vpop.xlane.xlu0 %75 }
  0x77   :  { %vm79_vm1 = vcmp.eq.f32.partialorder %v71_v0, %v76_v4 }
  0x78   :  { %v80_v5 = vsel %vm79_vm1, %v78_v3, 16 }
  0x79   :  { %v81_v6 = vsel %vm73_vm0, %v80_v5, 2147483647 }
  0x7a   :  { %v83_v7 = vshra.s32 %v81_v6, 16  ;;  %v82_v9 = vand.u32 65535, %v81_v6 }
  0x7c   :  { %v85_v8 = vcvt.s32.f32 %v83_v7  ;;  %v84_v11 = vcvt.s32.f32 %v82_v9 }
  0x7e   :  { %86 = vmin.xlane.f32.xlu0 %v85_v8 }
  0xf1   :  { %v87_v10 = vpop.xlane.xlu0 %86 }
  0xf2   :  { %vm88_vm2 = vcmp.eq.f32.partialorder %v85_v8, %v87_v10  ;;  %v93_v13 = vcvt.f32.s32 %v87_v10 }
  0xf3   :  { %v89_v12 = vsel %vm88_vm2, %v84_v11, inf }
  0xf4   :  { %90 = vmin.xlane.f32.xlu1 %v89_v12  ;;  %v94_v15 = vshll.u32 %v93_v13, 16 }
 0x167   :  { %v91_v14 = vpop.xlane.xlu1 %90 }
 0x168   :  { %v92_v16 = vcvt.f32.s32 %v91_v14 }
 0x16a   :  { %v95_v18 = vadd.s32 %v94_v15, %v92_v16 }
 0x16c   :  { %vm103_vm4 = vcmp.eq.s32.totalorder %v95_v18, %v72_v17 }
 0x16d   :  { %v105_v20 = vsel %vm103_vm4, 1.0, %v188_v19 }
 0x16e   :  { %v107_v21 = vsel %vm106_vm3, %v105_v20, 0.0 }
 0x16f   :  { %108 = vadd.xlane.f32.xlu1 %v107_v21 }
 0x1e2   :  { %v109_v22 = vpop.xlane.xlu1 %108 }
 0x1e3   :  { %v110_v23 = vrot.slane %v109_v22, 4 }
 0x1e5   :  { %v111_v24 = vadd.f32 %v110_v23, %v109_v22 }
 0x1e7   :  { %v112_v25 = vrot.slane %v111_v24, 2 }
 0x1e9   :  { %v113_v26 = vadd.f32 %v112_v25, %v111_v24 }
 0x1eb   :  { %v114_v27 = vrot.slane %v113_v26, 1 }
 0x1ed   :  { %v115_v28 = vadd.f32 %v114_v27, %v113_v26 }
 0x1ef   :  { %152 = vpush %v115_v28 }
 0x220   :  { %s153_s12 = spop %152 }
 0x221   :  { %p154_p0 = scmp.lt.s32.totalorder %s153_s12, 0  ;;  %s155_s1 = sceil.f32 %s153_s12 }
 0x222   :  { %s156_s13 = sfloor.f32 %s153_s12 }
 0x223   :  { %s219_s1 = smov (!%p154_p0, %s155_s1), %s156_s13 }
 0x224   :  { %s158_s14 = scvt.f32.s32 %s219_s1 }
 0x226   :  { %v120_v31 = vstv %s158_s14 }
 0x227   :  { %v121_v32 = vsel %vm119_vm5, %v120_v31, 0 }
 0x228   :  { %v122_v33 = vadd.s32 %v121_v32, %v118_v30 }
 0x22a   :  { %123 = vst [vmem:[#allocation2] sm:$0x1] %v122_v33 }
 0x22b   :  { %134 = dma.vmem_to_hbm [thread:$0]  %s130_s16, 16, %s132_s19, [#allocation3]  }
 0x22c   :  { %186 = dma.done.wait [#allocation3], 16  }
 0x22d   :  { %187 = vsyncadd [#allocation3], 4294967280 }
 0x22e   :  { %139 = vsyncpa [#allocation3], 1 }

</bundles_post_ra>
